<compile_context>
chip_gen: v5e
topology: v5e:2x2
jax: 0.10.0
libtpu: 0.0.40
codegen_flags: <defaults>
</compile_context>

<pallas_src>
import jax
import jax.numpy as jnp
from jax.experimental import pallas as pl
from jax.experimental.pallas import tpu as pltpu


def _per_generation_budget():
    """Returns (bytes per embedding tile, vmem_limit_bytes) for this TPU gen."""
    kind = ""
    try:
        kind = jax.devices()[0].device_kind.lower()
    except Exception:
        pass
    if "v7" in kind or "7x" in kind:
        # 64 MiB physical VMEM: 2 inputs x 2 buffers x 6 MiB = 24 MiB + scratch.
        return 6 * 1024 * 1024, 48 * 1024 * 1024
    if "v5" in kind or "v6" in kind:
        # 128 MiB physical VMEM: 2 x 2 x 8 MiB = 32 MiB, well inside 64 MiB.
        return 8 * 1024 * 1024, 64 * 1024 * 1024
    # Unknown generation: use the conservative (v7x-safe) budget.
    return 6 * 1024 * 1024, 48 * 1024 * 1024


def _make_kernel(margin, inv_2b, total_rows, block_rows, tiles_per_split,
                 needs_mask):
    margin = float(margin)
    inv_2b = float(inv_2b)

    def kernel(o1_ref, o2_ref, y_ref, out_ref, acc_ref):
        c = pl.program_id(0)          # TensorCore / batch-half ("parallel")
        i = pl.program_id(1)          # sequential batch-tile axis ("arbitrary")

        @pl.when(i == 0)
        def _init():
            acc_ref[...] = jnp.zeros_like(acc_ref)

        # Hot path: (TB, D) elementwise + per-row reduction in f32; upcast
        # from the native (possibly bf16) dtype happens in a free VPU slot.
        d1 = o1_ref[...].astype(jnp.float32)
        d2 = o2_ref[...].astype(jnp.float32)
        diff = d1 - d2
        dist_sq = jnp.sum(diff * diff, axis=1, keepdims=True)       # (TB, 1)
        mdist = jnp.maximum(margin - jnp.sqrt(dist_sq), 0.0)        # (TB, 1)
        same = y_ref[...] != 0.0                                    # (TB, 1)
        per_pair = jnp.where(same, dist_sq, mdist * mdist)          # (TB, 1)

        if needs_mask:
            tile_start = (c * tiles_per_split + i) * block_rows
            overruns = tile_start + block_rows > total_rows

            @pl.when(jnp.logical_not(overruns))
            def _full():
                acc_ref[...] = acc_ref[...] + per_pair

            @pl.when(overruns)
            def _partial():
                # Select (not multiply) so garbage/NaN pad rows are discarded.
                row = tile_start + jax.lax.broadcasted_iota(
                    jnp.int32, per_pair.shape, 0)
                acc_ref[...] = acc_ref[...] + jnp.where(
                    row < total_rows, per_pair, 0.0)
        else:
            acc_ref[...] = acc_ref[...] + per_pair

        @pl.when(i == tiles_per_split - 1)
        def _fin():
            total = jnp.sum(acc_ref[...]) * inv_2b
            out_ref[...] = jnp.broadcast_to(total, (1, 8, 128))

    return kernel


def contrastive_loss(out1, out2, lbl1, lbl2, margin=2.0, block_rows=None):
    """out1, out2: (B, D) float; lbl1, lbl2: (B,) int. Returns scalar f32 loss."""
    B, D = out1.shape
    if not jnp.issubdtype(out1.dtype, jnp.floating):
        out1 = out1.astype(jnp.float32)
    if not jnp.issubdtype(out2.dtype, jnp.floating):
        out2 = out2.astype(jnp.float32)

    # Precompute y = (lbl1 == lbl2): one (B,1) f32 input instead of two labels.
    y = (lbl1.reshape(B, 1) == lbl2.reshape(B, 1)).astype(jnp.float32)

    itemsizes = [jnp.dtype(out1.dtype).itemsize, jnp.dtype(out2.dtype).itemsize]
    # dtype-aware sublane granularity: 8 rows (4B), 16 rows (2B), 32 rows (1B).
    sublane = max(8, 32 // max(min(itemsizes), 1))
    padded_b = ((B + sublane - 1) // sublane) * sublane

    tile_bytes, vmem_limit = _per_generation_budget()

    if block_rows is None:
        bytes_per_row = max(D * max(itemsizes), 1)
        target = tile_bytes // bytes_per_row
        block_rows = max(sublane, min(8192, (target // sublane) * sublane))
    else:
        block_rows = max(sublane,
                         ((block_rows + sublane - 1) // sublane) * sublane)
    block_rows = min(block_rows, padded_b)

    tiles_total = pl.cdiv(B, block_rows)
    num_splits = 2 if tiles_total >= 2 else 1          # v7x: one half per TC
    tiles_per_split = pl.cdiv(tiles_total, num_splits)
    needs_mask = (num_splits * tiles_per_split * block_rows) != B
    last_tile = tiles_total - 1

    kernel = _make_kernel(
        margin=margin,
        inv_2b=1.0 / (2.0 * B),
        total_rows=B,
        block_rows=block_rows,
        tiles_per_split=tiles_per_split,
        needs_mask=needs_mask,
    )

    def emb_map(c, i):
        # Clamp so a core's trailing (fully out-of-range) tile re-reads the
        # last valid block instead of DMA-ing out of bounds; the in-kernel
        # row mask zeroes its contribution.
        return (jnp.minimum(c * tiles_per_split + i, last_tile), 0)

    partials = pl.pallas_call(
        kernel,
        out_shape=jax.ShapeDtypeStruct((num_splits, 8, 128), jnp.float32),
        grid=(num_splits, tiles_per_split),
        in_specs=[
            pl.BlockSpec((block_rows, D), emb_map),   # out1 tile
            pl.BlockSpec((block_rows, D), emb_map),   # out2 tile
            pl.BlockSpec((block_rows, 1), emb_map),   # y tile
        ],
        out_specs=pl.BlockSpec((1, 8, 128), lambda c, i: (c, 0, 0)),
        scratch_shapes=[pltpu.VMEM((block_rows, 1), jnp.float32)],
        compiler_params=pltpu.CompilerParams(
            dimension_semantics=("parallel", "arbitrary"),
            vmem_limit_bytes=vmem_limit,
        ),
    )(out1, out2, y)

    return jnp.sum(partials[:, 0, 0])


def contrastive_loss_ref(out1, out2, lbl1, lbl2, margin=2.0):
    out1 = out1.astype(jnp.float32)
    out2 = out2.astype(jnp.float32)
    diff = out1 - out2
    dist_sq = jnp.sum(diff * diff, axis=1)
    mdist = jnp.maximum(margin - jnp.sqrt(dist_sq), 0.0)
    yv = (lbl1 == lbl2).astype(jnp.float32)
    loss = yv * dist_sq + (1.0 - yv) * mdist * mdist
    return jnp.sum(loss) / 2.0 / out1.shape[0]


if __name__ == "__main__":
    key = jax.random.PRNGKey(0)
    k1, k2, k3, k4 = jax.random.split(key, 4)

    # Case 1: f32, B not a multiple of the tile -> 2-way split + masked
    # partial tile + one fully-out-of-range (clamped) tile.
    B, D = 20, 32
    out1 = jax.random.normal(k1, (B, D), dtype=jnp.float32)
    out2 = jax.random.normal(k2, (B, D), dtype=jnp.float32)
    lbl1 = jax.random.randint(k3, (B,), 0, 3, dtype=jnp.int32)
    lbl2 = jax.random.randint(k4, (B,), 0, 3, dtype=jnp.int32)

    loss = contrastive_loss(out1, out2, lbl1, lbl2, margin=2.0, block_rows=8)
    jax.block_until_ready(loss)
    ref = contrastive_loss_ref(out1, out2, lbl1, lbl2, margin=2.0)
    assert jnp.allclose(loss, ref, rtol=1e-5, atol=1e-5), (loss, ref)

    # Case 2: bf16 embeddings stay bf16 through the DMA, upcast in-kernel;
    # single tile, single split.
    B2, D2 = 16, 128
    o1b = jax.random.normal(k2, (B2, D2), dtype=jnp.float32).astype(jnp.bfloat16)
    o2b = jax.random.normal(k3, (B2, D2), dtype=jnp.float32).astype(jnp.bfloat16)
    l1b = jax.random.randint(k4, (B2,), 0, 4, dtype=jnp.int32)
    l2b = jax.random.randint(k1, (B2,), 0, 4, dtype=jnp.int32)

    loss2 = contrastive_loss(o1b, o2b, l1b, l2b, margin=2.0)
    jax.block_until_ready(loss2)
    ref2 = contrastive_loss_ref(o1b, o2b, l1b, l2b, margin=2.0)
    assert jnp.allclose(loss2, ref2, rtol=1e-5, atol=1e-5), (loss2, ref2)

    # Case 3: even 2-way split, multi-step per split, no masking needed.
    B3, D3 = 64, 32
    o13 = jax.random.normal(k3, (B3, D3), dtype=jnp.float32)
    o23 = jax.random.normal(k4, (B3, D3), dtype=jnp.float32)
    l13 = jax.random.randint(k1, (B3,), 0, 5, dtype=jnp.int32)
    l23 = jax.random.randint(k2, (B3,), 0, 5, dtype=jnp.int32)

    loss3 = contrastive_loss(o13, o23, l13, l23, margin=2.0, block_rows=16)
    jax.block_until_ready(loss3)
    ref3 = contrastive_loss_ref(o13, o23, l13, l23, margin=2.0)
    assert jnp.allclose(loss3, ref3, rtol=1e-5, atol=1e-5), (loss3, ref3)

    print("KERNEL_OK")
</pallas_src>

<mosaic_0001>
module attributes {stable_mosaic.version = 11 : i64} {
  func.func @kernel(%arg0: i32, %arg1: i32, %arg2: memref<8x32xf32, #tpu.memory_space<vmem>>, %arg3: memref<8x32xf32, #tpu.memory_space<vmem>>, %arg4: memref<8x1xf32, #tpu.memory_space<vmem>>, %arg5: memref<1x8x128xf32, #tpu.memory_space<vmem>>, %arg6: memref<8x1xf32, #tpu.memory_space<vmem>>) attributes {dimension_semantics = [#tpu.dimension_semantics<parallel>, #tpu.dimension_semantics<arbitrary>], iteration_bounds = array<i64: 2, 2>, scalar_prefetch = 0 : i64, scratch_operands = 1 : i64, tpu.core_type = #tpu.core_type<tc>, window_params = [{transform_indices = @transform_0, window_bounds = array<i64: 8, 32>}, {transform_indices = @transform_1, window_bounds = array<i64: 8, 32>}, {transform_indices = @transform_2, window_bounds = array<i64: 8, 1>}, {transform_indices = @transform_3, window_bounds = array<i64: 1, 8, 128>}]} {
    %c0_i32 = arith.constant 0 : i32
    %0 = arith.cmpi eq, %arg1, %c0_i32 : i32
    %1 = arith.extui %0 : i1 to i32
    %c0_i32_0 = arith.constant 0 : i32
    %2 = arith.cmpi ne, %1, %c0_i32_0 : i32
    scf.if %2 {
      %cst_13 = arith.constant 0.000000e+00 : f32
      %32 = vector.broadcast %cst_13 : f32 to vector<8x1xf32>
      %c0_14 = arith.constant 0 : index
      %c0_15 = arith.constant 0 : index
      %33 = vector.load %arg6[%c0_14, %c0_15] : memref<8x1xf32, #tpu.memory_space<vmem>>, vector<8x1xf32>
      tpu.vector_store %arg6[%c0_14, %c0_15], %32 {strides = array<i32>} : memref<8x1xf32, #tpu.memory_space<vmem>>, vector<8x1xf32>,
    } else {
    }
    %c0 = arith.constant 0 : index
    %c0_1 = arith.constant 0 : index
    %3 = vector.load %arg2[%c0, %c0_1] : memref<8x32xf32, #tpu.memory_space<vmem>>, vector<8x32xf32>
    %c0_2 = arith.constant 0 : index
    %c0_3 = arith.constant 0 : index
    %4 = vector.load %arg3[%c0_2, %c0_3] : memref<8x32xf32, #tpu.memory_space<vmem>>, vector<8x32xf32>
    %5 = arith.subf %3, %4 : vector<8x32xf32>
    %6 = arith.mulf %5, %5 : vector<8x32xf32>
    %cst = arith.constant dense<0.000000e+00> : vector<8xf32>
    %7 = vector.multi_reduction <add>, %6, %cst [1] : vector<8x32xf32> to vector<8xf32>
    %8 = vector.shape_cast %7 : vector<8xf32> to vector<8x1xf32>
    %9 = math.sqrt %8 : vector<8x1xf32>
    %cst_4 = arith.constant 2.000000e+00 : f32
    %10 = vector.broadcast %cst_4 : f32 to vector<8x1xf32>
    %11 = arith.subf %10, %9 : vector<8x1xf32>
    %cst_5 = arith.constant 0.000000e+00 : f32
    %12 = vector.broadcast %cst_5 : f32 to vector<8x1xf32>
    %13 = arith.maximumf %11, %12 : vector<8x1xf32>
    %c0_6 = arith.constant 0 : index
    %c0_7 = arith.constant 0 : index
    %14 = vector.load %arg4[%c0_6, %c0_7] : memref<8x1xf32, #tpu.memory_space<vmem>>, vector<8x1xf32>
    %cst_8 = arith.constant 0.000000e+00 : f32
    %15 = vector.broadcast %cst_8 : f32 to vector<8x1xf32>
    %16 = arith.cmpf one, %14, %15 : vector<8x1xf32>
    %17 = arith.mulf %13, %13 : vector<8x1xf32>
    %18 = arith.select %16, %8, %17 : vector<8x1xi1>, vector<8x1xf32>
    %c2_i32 = arith.constant 2 : i32
    %19 = arith.muli %arg0, %c2_i32 : i32
    %20 = arith.addi %19, %arg1 : i32
    %c8_i32 = arith.constant 8 : i32
    %21 = arith.muli %20, %c8_i32 : i32
    %c8_i32_9 = arith.constant 8 : i32
    %22 = arith.addi %21, %c8_i32_9 : i32
    %c20_i32 = arith.constant 20 : i32
    %23 = arith.cmpi sgt, %22, %c20_i32 : i32
    %true = arith.constant true
    %24 = arith.xori %23, %true : i1
    %25 = arith.extui %24 : i1 to i32
    %c0_i32_10 = arith.constant 0 : i32
    %26 = arith.cmpi ne, %25, %c0_i32_10 : i32
    scf.if %26 {
      %c0_13 = arith.constant 0 : index
      %c0_14 = arith.constant 0 : index
      %32 = vector.load %arg6[%c0_13, %c0_14] : memref<8x1xf32, #tpu.memory_space<vmem>>, vector<8x1xf32>
      %33 = arith.addf %32, %18 : vector<8x1xf32>
      %c0_15 = arith.constant 0 : index
      %c0_16 = arith.constant 0 : index
      %34 = vector.load %arg6[%c0_15, %c0_16] : memref<8x1xf32, #tpu.memory_space<vmem>>, vector<8x1xf32>
      tpu.vector_store %arg6[%c0_15, %c0_16], %33 {strides = array<i32>} : memref<8x1xf32, #tpu.memory_space<vmem>>, vector<8x1xf32>,
    } else {
    }
    %27 = arith.extui %23 : i1 to i32
    %c0_i32_11 = arith.constant 0 : i32
    %28 = arith.cmpi ne, %27, %c0_i32_11 : i32
    scf.if %28 {
      %32 = tpu.iota {dimensions = array<i32: 0>} : vector<8x1xi32>
      %33 = vector.broadcast %21 : i32 to vector<8x1xi32>
      %34 = arith.addi %33, %32 : vector<8x1xi32>
      %c0_13 = arith.constant 0 : index
      %c0_14 = arith.constant 0 : index
      %35 = vector.load %arg6[%c0_13, %c0_14] : memref<8x1xf32, #tpu.memory_space<vmem>>, vector<8x1xf32>
      %c20_i32_15 = arith.constant 20 : i32
      %36 = vector.broadcast %c20_i32_15 : i32 to vector<8x1xi32>
      %37 = arith.cmpi slt, %34, %36 : vector<8x1xi32>
      %cst_16 = arith.constant 0.000000e+00 : f32
      %38 = vector.broadcast %cst_16 : f32 to vector<8x1xf32>
      %39 = arith.select %37, %18, %38 : vector<8x1xi1>, vector<8x1xf32>
      %40 = arith.addf %35, %39 : vector<8x1xf32>
      %c0_17 = arith.constant 0 : index
      %c0_18 = arith.constant 0 : index
      %41 = vector.load %arg6[%c0_17, %c0_18] : memref<8x1xf32, #tpu.memory_space<vmem>>, vector<8x1xf32>
      tpu.vector_store %arg6[%c0_17, %c0_18], %40 {strides = array<i32>} : memref<8x1xf32, #tpu.memory_space<vmem>>, vector<8x1xf32>,
    } else {
    }
    %c1_i32 = arith.constant 1 : i32
    %29 = arith.cmpi eq, %arg1, %c1_i32 : i32
    %30 = arith.extui %29 : i1 to i32
    %c0_i32_12 = arith.constant 0 : i32
    %31 = arith.cmpi ne, %30, %c0_i32_12 : i32
    scf.if %31 {
      %c0_13 = arith.constant 0 : index
      %c0_14 = arith.constant 0 : index
      %32 = vector.load %arg6[%c0_13, %c0_14] : memref<8x1xf32, #tpu.memory_space<vmem>>, vector<8x1xf32>
      %33 = vector.shape_cast %32 : vector<8x1xf32> to vector<1x8x1xf32>
      %cst_15 = arith.constant dense<0.000000e+00> : vector<1xf32>
      %34 = vector.multi_reduction <add>, %33, %cst_15 [1, 2] : vector<1x8x1xf32> to vector<1xf32>
      %35 = vector.shape_cast %34 : vector<1xf32> to vector<1x1x1xf32>
      %36 = vector.extract %35[0, 0, 0] : f32 from vector<1x1x1xf32>
      %cst_16 = arith.constant 2.500000e-02 : f32
      %37 = arith.mulf %36, %cst_16 : f32
      %38 = vector.broadcast %37 : f32 to vector<1x8x128xf32>
      %c0_17 = arith.constant 0 : index
      %c0_18 = arith.constant 0 : index
      %c0_19 = arith.constant 0 : index
      %39 = vector.load %arg5[%c0_17, %c0_18, %c0_19] : memref<1x8x128xf32, #tpu.memory_space<vmem>>, vector<1x8x128xf32>
      tpu.vector_store %arg5[%c0_17, %c0_18, %c0_19], %38 {strides = array<i32>} : memref<1x8x128xf32, #tpu.memory_space<vmem>>, vector<1x8x128xf32>,
    } else {
    }
    return
  }
  func.func @transform_0(%arg0: i32, %arg1: i32) -> (i32, i32) {
    %c2_i32 = arith.constant 2 : i32
    %0 = arith.muli %arg0, %c2_i32 : i32
    %1 = arith.addi %0, %arg1 : i32
    %c2_i32_0 = arith.constant 2 : i32
    %2 = arith.minsi %1, %c2_i32_0 : i32
    %c0_i32 = arith.constant 0 : i32
    %c0_i32_1 = arith.constant 0 : i32
    return %2, %c0_i32 : i32, i32
  }
  func.func @transform_1(%arg0: i32, %arg1: i32) -> (i32, i32) {
    %c2_i32 = arith.constant 2 : i32
    %0 = arith.muli %arg0, %c2_i32 : i32
    %1 = arith.addi %0, %arg1 : i32
    %c2_i32_0 = arith.constant 2 : i32
    %2 = arith.minsi %1, %c2_i32_0 : i32
    %c0_i32 = arith.constant 0 : i32
    %c0_i32_1 = arith.constant 0 : i32
    return %2, %c0_i32 : i32, i32
  }
  func.func @transform_2(%arg0: i32, %arg1: i32) -> (i32, i32) {
    %c2_i32 = arith.constant 2 : i32
    %0 = arith.muli %arg0, %c2_i32 : i32
    %1 = arith.addi %0, %arg1 : i32
    %c2_i32_0 = arith.constant 2 : i32
    %2 = arith.minsi %1, %c2_i32_0 : i32
    %c0_i32 = arith.constant 0 : i32
    %c0_i32_1 = arith.constant 0 : i32
    return %2, %c0_i32 : i32, i32
  }
  func.func @transform_3(%arg0: i32, %arg1: i32) -> (i32, i32, i32) {
    %c0_i32 = arith.constant 0 : i32
    %c0_i32_0 = arith.constant 0 : i32
    %c0_i32_1 = arith.constant 0 : i32
    return %arg0, %c0_i32, %c0_i32_0 : i32, i32, i32
  }
}

</mosaic_0001>

<bundles_post_ra>
// kernel: tpu_custom_call.1
= control target key start
LH: loop header
LB: loop body
LE: loop exit
PB: predicated region body
PF: predicated region fallthrough
CT: control target
= control target key end

     0   :  { %8 = vsyncpa [#allocation4], 0  ;;  %s1030_s0 = inlined_call_operand.vmem [shape: f32[20,32], index: 0, kind: input, shape index: {}]   ;;  %s1031_s1 = inlined_call_operand.hbm [shape: f32[20,32], index: 1, kind: input, shape index: {}]   ;;  %s1032_s2 = inlined_call_operand.vmem [shape: f32[20,1], index: 2, kind: input, shape index: {}]   ;;  %s1033_s3 = inlined_call_operand.hbm [shape: f32[2,8,128], index: 3, kind: output, shape index: {}]  }
   0x1   :  { %10 = vsyncpa [#allocation4 + $0x1], 0 }
   0x2   :  { %11 = vsyncpa [#allocation5], 0 }
   0x3   :  { %13 = vsyncpa [#allocation5 + $0x1], 0  ;;  %s822_s12 = smov 0   ;;  %s824_s13 = smov 0  }
   0x4   :  { %s826_s14 = smov 0   ;;  %s828_s15 = smov 0  }
   0x5   :  { %s830_s16 = smov 0   ;;  %s832_s17 = smov 0  }
   0x6   :  { %s834_s18 = smov 0   ;;  %s836_s19 = smov 0  }
   0x7   :  { %s838_s20 = smov 0   ;;  %s840_s21 = smov 0  }
   0x8   :  { %s842_s22 = smov 0  }
   0x9 LB: > { %1038 = sst [smem:[#allocation9_spill]] %s791_s20  ;;  %s504_s23 = sadd.s32 4294967295, %s799_s22   ;;  %s799_s22 = sphi %s842_s22, %s19_s22   ;;  %s795_s21 = sphi %s840_s21, %s1049_s21   ;;  %s791_s20 = sphi %s838_s20, %s1048_s20   ;;  %s787_s19 = sphi %s836_s19, %s1047_s19   ;;  %s783_s18 = sphi %s834_s18, %s1046_s18   ;;  %s779_s17 = sphi %s832_s17, %s1055_s17   ;;  %s775_s16 = sphi %s830_s16, %s1054_s16   ;;  %s771_s15 = sphi %s828_s15, %s1053_s15   ;;  %s767_s14 = sphi %s826_s14, %s1052_s14   ;;  %s763_s13 = sphi %s824_s13, %s1051_s13   ;;  %s759_s12 = sphi %s822_s12, %s1050_s12  }
   0xa   : > { %1039 = sst [smem:[#allocation10_spill]] %s795_s21  ;;  %s505_s24 = sadd.s32 4294967294, %s799_s22  }
   0xb   : > { %s28_s25 = sadd.s32 1, %s791_s20  ;;  %s31_s26 = sadd.s32 1, %s795_s21 }
   0xc   : > { %p29_p0 = scmp.ge.s32.totalorder %s28_s25, 2  ;;  %s508_s27 = sshll.u32 %s795_s21, 1 }
   0xd   : > { %s70_s28 = sadd.s32 %s791_s20, %s508_s27  ;;  %s80_s29 = sadd.s32 1, %s779_s17 }
   0xe   : > { %s1057_s25 = smov (%p29_p0, %s28_s25), 0  ;;  %s1059_s26 = smov (!%p29_p0, %s31_s26), %s795_s21 }
   0xf   : > { %1040 = sst [smem:[#allocation11_spill]] %s1057_s25  ;;  %p71_p1 = scmp.lt.s32.totalorder %s70_s28, 2 }
  0x10   : > { %p87_p2 = scmp.ne.s32.totalorder %s779_s17, %s775_s16  ;;  %p33_p3 = scmp.ge.s32.totalorder %s1059_s26, 2 }
  0x11   : > { %p88_p4 = scmp.eq.s32.totalorder %s799_s22, 0  ;;  %s1061_s28 = smov (!%p71_p1, %s70_s28), 2 }
  0x12   : > { %s1063_s26 = smov (%p33_p3, %s1059_s26), 0  ;;  %p93_p6 = scmp.ne.s32.totalorder %s775_s16, %s771_s15 }
  0x13   : > { %1041 = sst [smem:[#allocation12_spill]] %s1063_s26  ;;  %p892_p5 = por %p88_p4, %p87_p2 }
  0x14   : > { %s509_s4 = sshll.u32 %s1063_s26, 1  ;;  %p94_p7 = scmp.eq.s32.totalorder %s504_s23, 0 }
  0x15   : > { %s74_s5 = sadd.s32 %s509_s4, %s1057_s25  ;;  %s137_s6 = ssub.s32 %s795_s21, %s1063_s26 }
  0x16   : > { %p75_p8 = scmp.lt.s32.totalorder %s74_s5, 2  ;;  %p904_p9 = por %p94_p7, %p93_p6 }
  0x17   : > { %p138_p10 = scmp.eq.s32.totalorder %s137_s6, 0  ;;  %s140_s8 = sadd.s32 1, %s767_s14 }
  0x18   : > { %s1065_s5 = smov (!%p75_p8, %s74_s5), 2  ;;  %p150_p11 = scmp.ne.s32.totalorder %s767_s14, %s763_s13 }
  0x19   : > { %s910_s9 = scalar_select %p138_p10, %s767_s14, %s140_s8  }
  0x1a   : > { %s77_s10 = ssub.s32 %s1061_s28, %s1065_s5  ;;  %p151_p13 = scmp.eq.s32.totalorder %s504_s23, 3 }
  0x1b   : > { %p78_p12 = scmp.eq.s32.totalorder %s77_s10, 0  ;;  %p156_p0 = scmp.ne.s32.totalorder %s763_s13, %s759_s12 }
  0x1c   : > { %p157_p1 = scmp.eq.s32.totalorder %s505_s24, 3  ;;  %p923_p2 = por %p151_p13, %p150_p11 }
  0x1d   : > { %s921_s11 = scalar_select %p78_p12, %s779_s17, %s80_s29  }
  0x1e   : > { %p927_p3 = por %p157_p1, %p156_p0  ;;  %p554_p4 = scmp.lt.s32.totalorder %s799_s22, 4 }
  0x1f   : > { %s192_s4 = sand.u32 1, %s779_s17   ;;  %s516_s5 = sshll.u32 %s1061_s28, 3 }
  0x20   : > { %s514_s23 = sshll.u32 %s192_s4, 3  ;;  %s204_s10 = scalar_lea.hbm %s1031_s1, %s516_s5 }
  0x21   : > { %s206_s24 = sshll.u32 %s204_s10, 4  ;;  %s196_s26 = scalar_lea.vmem [#allocation3], %s514_s23  ;;  %s207_s24 = int_to_ptr.hbm [resolvable:$true] %s206_s24 }
  0x22   : > { %s208_s29 = sshll.u32 %s196_s26, 4  ;;  %p547_p6 = pnand %p554_p4, %p892_p5  ;;  %s209_s29 = int_to_ptr.vmem [resolvable:$true] %s208_s29 }
  0x23   : > { %p517_p7 = scmp.ge.s32.totalorder %s799_s22, 1  ;;  %p228_p8 = scmp.lt.s32.totalorder %s799_s22, 5 }
  0x24   : > { %s193_s25 = scalar_lea.sflag [#allocation4], %s192_s4 }
  0x25   : > { %549 = dma.hbm_to_vmem [thread:$0]  (!%p547_p6), %s207_s24, 128, %s209_s29, %s193_s25  }
  0x26   : > { %p229_p10 = pnand %p517_p7, %p228_p8 }
  0x27   : > { %s234_s28 = sand.u32 (!%p229_p10), 1, %s775_s16  }
  0x28   : > { %232 = sbr.rel (%p229_p10) target bundleno = 436 (0x1b4), region = 32  ;;  %s518_s21 = sshll.u32 (!%p229_p10), %s234_s28, 3 }
  0x29   : > { %s235_s20 = scalar_lea.sflag (!%p229_p10), [#allocation4], %s234_s28  ;;  %s238_s6 = scalar_lea.vmem (!%p229_p10), [#allocation3], %s518_s21 }
  0x2d   : > { %750 = dma.done.wait (%p904_p9), %s235_s20, 128  }
  0x2e   : > { %752 = vsyncadd (%p904_p9), %s235_s20, 4294967168  ;;  %s275_s26 = sand.u32 1, %s763_s13   ;;  %s520_s30 = sshll.u32 %s787_s19, 1 }
  0x2f   : > { %s949_s25 = sshll.u32 %s275_s26, 3  ;;  %s952_s4 = sadd.s32 %s783_s18, %s520_s30 }
  0x30   : > { %p280_p5 = scmp.lt.s32.totalorder %s952_s4, 2  ;;  %s277_s29 = scalar_lea.vmem [#allocation6], %s949_s25 }
  0x31   : > { %p530_p9 = scmp.ne.s32.totalorder %s783_s18, 0 }
  0x32   : > { %s281_s21 = scalar_select %p280_p5, %s952_s4, 2 }
  0x33   : > { %309 = sbr.rel (%p530_p9) target bundleno = 58 (0x3a), region = 40 }
  0x34   : > { %s1067_s21 = smov (!%p280_p5, %s281_s21), 2 }
  0x35   : > { %s524_s5 = sshll.u32 %s1067_s21, 3 }
  0x36   : > { %s285_s23 = scalar_lea.vmem %s1030_s0, %s524_s5  ;;  %s962_s24 = scalar_lea.vmem %s1032_s2, %s524_s5 }
  0x38   : > { %vm310_vm0 = vcmask 7168   ;;  %v801_v0 = vmov 0.0  }
  0x39   : > { %311 = vst.msk [vmem:[#allocation2] sm:$0xff] %vm310_vm0, %v801_v0 }
  0x3a PF: > { %v312_v1 = vld [vmem:[%s285_s23] sm:$0xff]  ;;  %v313_v2 = vld [vmem:[%s238_s6] sm:$0xff]  ;;  %vm316_vm1 = vcmask 261120   ;;  %s532_s28 = sshll.u32 %s952_s4, 3 }
  0x3b   : > { %v314_v3 = vsub.f32 %v312_v1, %v313_v2  ;;  %s341_s30 = sadd.s32 8, %s532_s28  ;;  %v334_v18 = vld [vmem:[%s962_s24] sm:$0xff] }
  0x3c   : > { %vm335_vm4 = vcmp.ne.f32.partialorder %v334_v18, 0.0  ;;  %p533_p11 = scmp.gt.s32.totalorder %s341_s30, 20 }
  0x3d   : > { %v315_v4 = vmul.f32 %v314_v3, %v314_v3 }
  0x3f   : > { %v317_v5 = vsel %vm316_vm1, %v315_v4, 0.0 }
  0x40   : > { %318 = vadd.xlane.f32.xlu0 %v317_v5 }
  0xb3   : > { %v319_v6 = vpop.xlane.xlu0 %318 }
  0xb4   : > { %645 = vrsqrt.f32 %v319_v6  ;;  %vm327_vm2 = vcmp.eq.f32.partialorder %v319_v6, inf  ;;  %v330_v14 = vand.u32 2147483648, %v319_v6  ;;  %vm329_vm3 = vcmp.eq.f32.partialorder %v319_v6, 0.0 }
  0xba   : > { %v646_v7 = vpop.eup %645 }
  0xbb   : > { %v321_v8 = vmul.f32 %v646_v7, %v319_v6 }
  0xbd   : > { %v322_v9 = vmul.f32 %v646_v7, %v321_v8 }
  0xbf   : > { %v323_v10 = vmul.f32 0.5, %v322_v9 }
  0xc1   : > { %v324_v11 = vsub.f32 1.5, %v323_v10 }
  0xc3   : > { %v325_v12 = vmul.f32 %v646_v7, %v324_v11 }
  0xc5   : > { %v326_v13 = vmul.f32 %v325_v12, %v319_v6 }
  0xc7   : > { %v328_v15 = vsel %vm327_vm2, %v319_v6, %v326_v13 }
  0xc8   : > { %v331_v16 = vsel %vm329_vm3, %v330_v14, %v328_v15 }
  0xc9   : > { %v332_v17 = vsub.f32 2.0, %v331_v16 }
  0xcb   : > { %v333_v19 = vmax.f32 %v332_v17, 0.0  ;;  %346 = sbr.rel (%p533_p11) target bundleno = 212 (0xd4), region = 44 }
  0xcd   : > { %v336_v20 = vmul.f32 %v333_v19, %v333_v19 }
  0xcf   : > { %v337_v21 = vsel %vm335_vm4, %v319_v6, %v336_v20 }
  0xd0   : > { %v347_v22 = vld [vmem:[#allocation2] sm:$0xff]  ;;  %vm349_vm5 = vcmask 7168  }
  0xd1   : > { %v348_v23 = vadd.f32 %v347_v22, %v337_v21 }
  0xd3   : > { %350 = vst.msk [vmem:[#allocation2] sm:$0xff] %vm349_vm5, %v348_v23 }
  0xd4 PF: > { %p534_p12 = scmp.le.s32.totalorder %s341_s30, 20 }
  0xd6   : > { %353 = sbr.rel (%p534_p12) target bundleno = 230 (0xe6), region = 48 }
  0xdb   : > { %v354_v24 = vlaneseq  ;;  %v356_v25 = vstv %s532_s28  ;;  %v358_v28 = vld [vmem:[#allocation2] sm:$0xff]  ;;  %vm362_vm7 = vcmask 7168  }
  0xdd   : > { %v355_v26 = vshrl.u32 %v354_v24, 7 }
  0xdf   : > { %v357_v27 = vadd.s32 %v356_v25, %v355_v26 }
  0xe1   : > { %vm359_vm6 = vcmp.lt.s32.totalorder %v357_v27, 20 }
  0xe2   : > { %v360_v29 = vsel %vm359_vm6, %v337_v21, 0.0 }
  0xe3   : > { %v361_v30 = vadd.f32 %v360_v29, %v358_v28 }
  0xe5   : > { %363 = vst.msk [vmem:[#allocation2] sm:$0xff] %vm362_vm7, %v361_v30 }
  0xe6 PF: > { %p535_p13 = scmp.ne.s32.totalorder %s783_s18, 1 }
  0xe8   : > { %367 = sbr.rel (%p535_p13) target bundleno = 421 (0x1a5), region = 52 }
  0xed   : > { %v368_v31 = vld [vmem:[#allocation2] sm:$0xff]  ;;  %vm369_vm8 = vcmask 7168  }
  0xee   : > { %v370_v32 = vsel %vm369_vm8, %v368_v31, 0.0 }
  0xef   : > { %371 = vadd.xlane.f32.xlu0 %v370_v32 }
 0x162   : > { %v372_v33 = vpop.xlane.xlu0 %371 }
 0x163   : > { %v373_v34 = vrot.slane %v372_v33, 4 }
 0x165   : > { %v374_v35 = vadd.f32 %v373_v34, %v372_v33 }
 0x167   : > { %v375_v36 = vrot.slane %v374_v35, 2 }
 0x169   : > { %v376_v37 = vadd.f32 %v375_v36, %v374_v35 }
 0x16b   : > { %v377_v38 = vrot.slane %v376_v37, 1 }
 0x16d   : > { %v378_v39 = vadd.f32 %v377_v38, %v376_v37 }
 0x16f   : > { %540 = vpush %v378_v39 }
 0x1a0   : > { %s541_s6 = spop %540 }
 0x1a1   : > { %s380_s4 = smul.f32 0.025, %s541_s6 }
 0x1a3   : > { %v381_v40 = vstv %s380_s4 }
 0x1a4   : > { %382 = vst [vmem:[%s277_s29] sm:$0xff] %v381_v40 }
 0x1a5 PF: > { %s537_s18 = sshll.u32 %s787_s19, 3  ;;  %s396_s20 = sshll.u32 %s277_s29, 4  ;;  %s397_s20 = int_to_ptr.vmem [resolvable:$true] %s396_s20 }
 0x1a6   : > { %s394_s7 = scalar_lea.hbm %s1033_s3, %s537_s18  ;;  %s384_s8 = scalar_lea.sflag [#allocation5], %s275_s26 }
 0x1a7   : > { %s398_s23 = sshll.u32 %s394_s7, 4  ;;  %s697_s30 = scalar_lea.hbm %s1033_s3, 16  ;;  %s399_s23 = int_to_ptr.hbm [resolvable:$true] %s398_s23 }
 0x1a8   : > { %s691_s10 = sshra.s32 %s399_s23, 4  ;;  %s692_s10 = int_to_ptr.hbm [resolvable:$true] %s691_s10 }
 0x1a9   : > { %s693_s24 = scalar_lea.hbm %s692_s10, 8  ;;  %p698_p6 = scmp.lt.s32.totalorder %s692_s10, %s1033_s3 }
 0x1aa   : > { %p694_p0 = scmp.ne.s32.totalorder %s692_s10, %s693_s24  ;;  %p699_p7 = scmp.lt.s32.totalorder %s697_s30, %s693_s24 }
 0x1ac   : > { %p695_p1 = pnand %p694_p0, %p923_p2  ;;  %p700_p8 = por %p699_p7, %p698_p6 }
 0x1ae   : > { %p696_p4 = pneg %p695_p1 }
 0x1b0   : > { %p701_p10 = pnand %p700_p8, %p696_p4 }
 0x1b2   : > { %704 = shalt.err (!%p701_p10)
}
 0x1b3   : > { %544 = dma.vmem_to_hbm [thread:$0]  (%p923_p2), %s397_s20, 128, %s399_s23, %s384_s8  }
 0x1b4 PF: > { %p555_p5 = scmp.ge.s32.totalorder %s799_s22, 2  ;;  %s410_s26 = sand.u32 1, %s759_s12  }
 0x1b5   : > { %s411_s25 = scalar_lea.sflag [#allocation5], %s410_s26 }
 0x1b6   : > { %p551_p9 = pnand %p555_p5, %p927_p3 }
 0x1b8   : > { %p552_p11 = pneg %p551_p9 }
 0x1ba   : > { %754 = dma.done.wait (%p552_p11), %s411_s25, 128  }
 0x1bb   : > { %756 = vsyncadd (%p552_p11), %s411_s25, 4294967168  ;;  %s19_s22 = sadd.s32 1, %s799_s22   ;;  %s1046_s18 = sld [smem:[#allocation9_spill]] }
 0x1bc   : > { %p16_p12 = scmp.ge.s32.totalorder %s19_s22, 6   ;;  %s1047_s19 = sld [smem:[#allocation10_spill]] }
 0x1bd   : > { %s1048_s20 = sld [smem:[#allocation11_spill]]  ;;  %s1050_s12 = smov %s763_s13 }
 0x1be   : > { %s1049_s21 = sld [smem:[#allocation12_spill]]  ;;  %s1051_s13 = smov %s767_s14 }
 0x1bf   : > { %s1052_s14 = smov %s910_s9  ;;  %s1053_s15 = smov %s775_s16 }
 0x1c0   : > { %s1054_s16 = smov %s779_s17  ;;  %s1055_s17 = smov %s921_s11 }
 0x1c1   :  { %18 = sbr.rel (!%p16_p12) target bundleno = 9 (0x9), region = 99 }
 0x1c6   :  { %417 = vsyncpa [#allocation4], 1 }
 0x1c7   :  { %419 = vsyncpa [#allocation4 + $0x1], 1 }
 0x1c8   :  { %420 = vsyncpa [#allocation5], 1 }
 0x1c9   :  { %422 = vsyncpa [#allocation5 + $0x1], 1 }

</bundles_post_ra>
